<compile_context>
chip_gen: v5e
topology: v5e:2x2
jax: 0.10.0
libtpu: 0.0.40
codegen_flags: <defaults>
</compile_context>

<pallas_src>
import jax
import jax.numpy as jnp
from jax.experimental import pallas as pl
from jax.experimental.pallas import tpu as pltpu


def _round_up(x, m):
    return ((x + m - 1) // m) * m


def _mlp_kernel(x_ref, w1_ref, b1_ref, w2_ref, b2_ref, o_ref):
    # Two MXU matmuls (bf16 in, f32 accumulate) + VPU bias/ReLU, fused.
    x = x_ref[...]                                          # (TM, obs)  bf16
    h = jnp.dot(x, w1_ref[...],
                preferred_element_type=jnp.float32)         # (TM, Hp)   f32
    h = jnp.maximum(h + b1_ref[...], 0.0)                   # bias + ReLU in f32
    y = jnp.dot(h.astype(jnp.bfloat16), w2_ref[...],
                preferred_element_type=jnp.float32)         # (TM, Np)   f32
    o_ref[...] = (y + b2_ref[...]).astype(o_ref.dtype)      # lane-dense store


def net_forward(x, w1, b1, w2, b2, *, block_m=512):
    """Forward pass of Net.

    x  : (B, obs_size)          float32
    w1 : (obs_size, hidden)     float32   (PyTorch weight transposed)
    b1 : (hidden,)              float32
    w2 : (hidden, n_actions)    float32   (PyTorch weight transposed)
    b2 : (n_actions,)           float32
    returns (B, n_actions)      float32
    """
    B, obs = x.shape
    hidden = w1.shape[1]
    n_actions = w2.shape[1]

    # Lane-dense padded sizes.
    Hp = _round_up(hidden, 128)
    Np = _round_up(n_actions, 128)
    TM = min(block_m, _round_up(B, 8))
    Bp = _round_up(B, TM)

    # Zero-pad (zero pad lanes contribute nothing: 0-weight cols/rows, 0 bias,
    # ReLU(0)=0).  Streaming operands cast to bf16; biases stay f32.
    xp = jnp.zeros((Bp, obs), jnp.bfloat16).at[:B].set(x.astype(jnp.bfloat16))
    w1p = jnp.zeros((obs, Hp), jnp.bfloat16).at[:, :hidden].set(
        w1.astype(jnp.bfloat16))
    b1p = jnp.zeros((1, Hp), jnp.float32).at[:, :hidden].set(b1.reshape(1, -1))
    w2p = jnp.zeros((Hp, Np), jnp.bfloat16).at[:hidden, :n_actions].set(
        w2.astype(jnp.bfloat16))
    b2p = jnp.zeros((1, Np), jnp.float32).at[:, :n_actions].set(b2.reshape(1, -1))

    grid = (Bp // TM,)

    flops = 2 * Bp * (obs * Hp + Hp * Np)
    bytes_accessed = (xp.size * 2 + w1p.size * 2 + w2p.size * 2
                      + b1p.size * 4 + b2p.size * 4 + Bp * Np * 4)

    out_padded = pl.pallas_call(
        _mlp_kernel,
        out_shape=jax.ShapeDtypeStruct((Bp, Np), jnp.float32),
        grid=grid,
        in_specs=[
            pl.BlockSpec((TM, obs), lambda i: (i, 0)),   # x: streams per tile
            pl.BlockSpec((obs, Hp), lambda i: (0, 0)),   # w1: VMEM-resident
            pl.BlockSpec((1, Hp), lambda i: (0, 0)),     # b1: VMEM-resident
            pl.BlockSpec((Hp, Np), lambda i: (0, 0)),    # w2: VMEM-resident
            pl.BlockSpec((1, Np), lambda i: (0, 0)),     # b2: VMEM-resident
        ],
        out_specs=pl.BlockSpec((TM, Np), lambda i: (i, 0)),
        compiler_params=pltpu.CompilerParams(
            dimension_semantics=("parallel",)),
        cost_estimate=pl.CostEstimate(
            flops=flops, transcendentals=0, bytes_accessed=bytes_accessed),
    )(xp, w1p, b1p, w2p, b2p)

    return out_padded[:B, :n_actions]


def init_params(key, obs_size, hidden_size, n_actions):
    """Deterministic init mirroring PyTorch Linear default (U[-1/sqrt(in), 1/sqrt(in)])."""
    k1, k2, k3, k4 = jax.random.split(key, 4)
    lim1 = 1.0 / jnp.sqrt(jnp.float32(obs_size))
    lim2 = 1.0 / jnp.sqrt(jnp.float32(hidden_size))
    # Stored as (in, out): transpose of PyTorch's (out, in) layout.
    w1 = jax.random.uniform(k1, (obs_size, hidden_size), jnp.float32, -lim1, lim1)
    b1 = jax.random.uniform(k2, (hidden_size,), jnp.float32, -lim1, lim1)
    w2 = jax.random.uniform(k3, (hidden_size, n_actions), jnp.float32, -lim2, lim2)
    b2 = jax.random.uniform(k4, (n_actions,), jnp.float32, -lim2, lim2)
    return w1, b1, w2, b2


if __name__ == "__main__":
    fwd = jax.jit(net_forward)

    # --- Toy shapes consistent with the module (CartPole-like sizes) ---------
    batch, obs_size, hidden_size, n_actions = 8, 4, 32, 2
    key = jax.random.PRNGKey(0)
    kx, kp = jax.random.split(key)
    x = jax.random.normal(kx, (batch, obs_size), jnp.float32)
    w1, b1, w2, b2 = init_params(kp, obs_size, hidden_size, n_actions)

    out = jax.block_until_ready(fwd(x, w1, b1, w2, b2))
    ref = jnp.maximum(x @ w1 + b1, 0.0) @ w2 + b2
    assert out.shape == (batch, n_actions)
    # bf16 streaming operands with f32 accumulation -> loosened tolerance.
    assert jnp.allclose(out, ref, atol=5e-2, rtol=5e-2), float(
        jnp.max(jnp.abs(out - ref)))

    # --- Larger batch: exercises the batch grid + padding/slicing path -------
    batch2 = 600  # non-multiple of the 512-row tile on purpose
    x2 = jax.random.normal(jax.random.PRNGKey(1), (batch2, obs_size), jnp.float32)
    out2 = jax.block_until_ready(fwd(x2, w1, b1, w2, b2))
    ref2 = jnp.maximum(x2 @ w1 + b1, 0.0) @ w2 + b2
    assert out2.shape == (batch2, n_actions)
    assert jnp.allclose(out2, ref2, atol=5e-2, rtol=5e-2), float(
        jnp.max(jnp.abs(out2 - ref2)))

    print("KERNEL_OK")
</pallas_src>

<mosaic_0001>
module attributes {stable_mosaic.version = 11 : i64} {
  func.func @_mlp_kernel(%arg0: i32, %arg1: memref<8x4xbf16, #tpu.memory_space<vmem>>, %arg2: memref<4x128xbf16, #tpu.memory_space<vmem>>, %arg3: memref<1x128xf32, #tpu.memory_space<vmem>>, %arg4: memref<128x128xbf16, #tpu.memory_space<vmem>>, %arg5: memref<1x128xf32, #tpu.memory_space<vmem>>, %arg6: memref<8x128xf32, #tpu.memory_space<vmem>>) attributes {dimension_semantics = [#tpu.dimension_semantics<parallel>], iteration_bounds = array<i64: 1>, scalar_prefetch = 0 : i64, scratch_operands = 0 : i64, tpu.core_type = #tpu.core_type<tc>, window_params = [{transform_indices = @transform_0, window_bounds = array<i64: 8, 4>}, {pipeline_mode = #tpu.pipeline_mode<synchronous>, transform_indices = @transform_1, window_bounds = array<i64: 4, 128>}, {pipeline_mode = #tpu.pipeline_mode<synchronous>, transform_indices = @transform_2, window_bounds = array<i64: 1, 128>}, {pipeline_mode = #tpu.pipeline_mode<synchronous>, transform_indices = @transform_3, window_bounds = array<i64: 128, 128>}, {pipeline_mode = #tpu.pipeline_mode<synchronous>, transform_indices = @transform_4, window_bounds = array<i64: 1, 128>}, {transform_indices = @transform_5, window_bounds = array<i64: 8, 128>}]} {
    %c0 = arith.constant 0 : index
    %c0_0 = arith.constant 0 : index
    %0 = vector.load %arg1[%c0, %c0_0] : memref<8x4xbf16, #tpu.memory_space<vmem>>, vector<8x4xbf16>
    %c0_1 = arith.constant 0 : index
    %c0_2 = arith.constant 0 : index
    %1 = vector.load %arg2[%c0_1, %c0_2] : memref<4x128xbf16, #tpu.memory_space<vmem>>, vector<4x128xbf16>
    %cst = arith.constant dense<0.000000e+00> : vector<8x128xf32>
    %2 = tpu.matmul %0, %1, %cst {dimension_numbers = #tpu.dot_dimension_numbers<[1], [0], [0], [1], [0, 0, 1, 1], [], []>} : vector<8x4xbf16>, vector<4x128xbf16>, vector<8x128xf32> -> vector<8x128xf32>
    %c0_3 = arith.constant 0 : index
    %c0_4 = arith.constant 0 : index
    %3 = vector.load %arg3[%c0_3, %c0_4] : memref<1x128xf32, #tpu.memory_space<vmem>>, vector<1x128xf32>
    %4 = vector.broadcast %3 : vector<1x128xf32> to vector<8x128xf32>
    %5 = arith.addf %2, %4 : vector<8x128xf32>
    %cst_5 = arith.constant 0.000000e+00 : f32
    %6 = vector.broadcast %cst_5 : f32 to vector<8x128xf32>
    %7 = arith.maximumf %5, %6 : vector<8x128xf32>
    %8 = arith.truncf %7 : vector<8x128xf32> to vector<8x128xbf16>
    %c0_6 = arith.constant 0 : index
    %c0_7 = arith.constant 0 : index
    %9 = vector.load %arg4[%c0_6, %c0_7] : memref<128x128xbf16, #tpu.memory_space<vmem>>, vector<128x128xbf16>
    %cst_8 = arith.constant dense<0.000000e+00> : vector<8x128xf32>
    %10 = tpu.matmul %8, %9, %cst_8 {dimension_numbers = #tpu.dot_dimension_numbers<[1], [0], [0], [1], [0, 0, 1, 1], [], []>} : vector<8x128xbf16>, vector<128x128xbf16>, vector<8x128xf32> -> vector<8x128xf32>
    %c0_9 = arith.constant 0 : index
    %c0_10 = arith.constant 0 : index
    %11 = vector.load %arg5[%c0_9, %c0_10] : memref<1x128xf32, #tpu.memory_space<vmem>>, vector<1x128xf32>
    %12 = vector.broadcast %11 : vector<1x128xf32> to vector<8x128xf32>
    %13 = arith.addf %10, %12 : vector<8x128xf32>
    %c0_11 = arith.constant 0 : index
    %c0_12 = arith.constant 0 : index
    %14 = vector.load %arg6[%c0_11, %c0_12] : memref<8x128xf32, #tpu.memory_space<vmem>>, vector<8x128xf32>
    tpu.vector_store %arg6[%c0_11, %c0_12], %13 {strides = array<i32>} : memref<8x128xf32, #tpu.memory_space<vmem>>, vector<8x128xf32>,
    return
  }
  func.func @transform_0(%arg0: i32) -> (i32, i32) {
    %c0_i32 = arith.constant 0 : i32
    %c0_i32_0 = arith.constant 0 : i32
    return %arg0, %c0_i32 : i32, i32
  }
  func.func @transform_1(%arg0: i32) -> (i32, i32) {
    %c0_i32 = arith.constant 0 : i32
    %c0_i32_0 = arith.constant 0 : i32
    %c0_i32_1 = arith.constant 0 : i32
    return %c0_i32, %c0_i32_0 : i32, i32
  }
  func.func @transform_2(%arg0: i32) -> (i32, i32) {
    %c0_i32 = arith.constant 0 : i32
    %c0_i32_0 = arith.constant 0 : i32
    %c0_i32_1 = arith.constant 0 : i32
    return %c0_i32, %c0_i32_0 : i32, i32
  }
  func.func @transform_3(%arg0: i32) -> (i32, i32) {
    %c0_i32 = arith.constant 0 : i32
    %c0_i32_0 = arith.constant 0 : i32
    %c0_i32_1 = arith.constant 0 : i32
    return %c0_i32, %c0_i32_0 : i32, i32
  }
  func.func @transform_4(%arg0: i32) -> (i32, i32) {
    %c0_i32 = arith.constant 0 : i32
    %c0_i32_0 = arith.constant 0 : i32
    %c0_i32_1 = arith.constant 0 : i32
    return %c0_i32, %c0_i32_0 : i32, i32
  }
  func.func @transform_5(%arg0: i32) -> (i32, i32) {
    %c0_i32 = arith.constant 0 : i32
    %c0_i32_0 = arith.constant 0 : i32
    return %arg0, %c0_i32 : i32, i32
  }
}

</mosaic_0001>

<bundles_post_ra>
// kernel: net_forward.1
= control target key start
LH: loop header
LB: loop body
LE: loop exit
PB: predicated region body
PF: predicated region fallthrough
CT: control target
= control target key end

     0   :  { %vm31_vm0 = vcmask 1041408   ;;  %vm27_vm1 = vcmask 31744   ;;  %s248_s1 = inlined_call_operand.vmem [shape: bf16[4,128], index: 1, kind: input, shape index: {}]   ;;  %s249_s0 = inlined_call_operand.vmem [shape: bf16[8,4], index: 0, kind: input, shape index: {}]   ;;  %s250_s3 = inlined_call_operand.vmem [shape: bf16[128,128], index: 3, kind: input, shape index: {}]   ;;  %s251_s2 = inlined_call_operand.vmem [shape: f32[1,128], index: 2, kind: input, shape index: {}]   ;;  %s252_s4 = inlined_call_operand.vmem [shape: f32[1,128], index: 4, kind: input, shape index: {}]   ;;  %s253_s5 = inlined_call_operand.vmem [shape: f32[8,128], index: 5, kind: output, shape index: {}]  }
   0x1   :  { %v22_v0 = vld [vmem:[%s248_s1] sm:$0x3]  ;;  %v176_v1 = vld [vmem:[%s250_s3 + $0x38] sm:$0xff]  ;;  %v175_v4 = vld [vmem:[%s250_s3 + $0x30] sm:$0xff] }
   0x2   :  { %v33_v2 = vsel %vm31_vm0, %v22_v0, 0  ;;  %v21_v3 = vld [vmem:[%s249_s0] sm:$0xf]  ;;  %118 = vmatpush.bf16.msra.mxu1 %v176_v1  ;;  %v174_v5 = vld [vmem:[%s250_s3 + $0x28] sm:$0xff]  ;;  %v172_v7 = vld [vmem:[%s250_s3 + $0x18] sm:$0xff] }
   0x3   :  { %42 = vmatpush.bf16.msra.mxu0 %v33_v2  ;;  %v173_v6 = vld [vmem:[%s250_s3 + $0x20] sm:$0xff]  ;;  %v171_v8 = vld [vmem:[%s250_s3 + $0x10] sm:$0xff]  ;;  %v170_v9 = vld [vmem:[%s250_s3 + $0x8] sm:$0xff] }
   0x4   :  { %v169_v10 = vld [vmem:[%s250_s3] sm:$0xff] }
   0x5   :  { %v177_v11 = vld [vmem:[%s251_s2] ss:$0 sm:$0xff] }
   0x6   :  { %136 = vmatmul.msk.bf16.vlgmr.msra.gmra.mxu0 %vm27_vm1, %v21_v3  ;;  %119 = vmatpush.bf16.msra.mxu1 %v175_v4  ;;  %v178_v17 = vld [vmem:[%s252_s4] ss:$0 sm:$0xff] }
   0xa   :  { %120 = vmatpush.bf16.msra.mxu1 %v174_v5 }
   0xe   :  { %121 = vmatpush.bf16.msra.mxu1 %v173_v6 }
  0x12   :  { %122 = vmatpush.bf16.msra.mxu1 %v172_v7 }
  0x16   :  { %123 = vmatpush.bf16.msra.mxu1 %v171_v8 }
  0x1a   :  { %124 = vmatpush.bf16.msra.mxu1 %v170_v9 }
  0x1e   :  { %125 = vmatpush.bf16.msra.mxu1 %v169_v10 }
  0x83   :  { %v44_v12 = vpop.f32.mrf.mxu0 }
  0x84   :  { %v45_v13 = vadd.f32 %v177_v11, %v44_v12 }
  0x86   :  { %v48_v14 = vmax.f32 %v45_v13, 0.0 }
  0x88   :  { %v49_v15 = vpack.c.bf16 %v48_v14, %v48_v14 }
  0x8a   :  { %126 = vmatmul.bf16.vlgmr.msra.gmra.mxu1 %v49_v15 }
  0x8b   :  { %v46_v16 = vpop.f32.mrf.mxu0 }
 0x107   :  { %v127_v18 = vpop.f32.mrf.mxu1 }
 0x108   :  { %v128_v19 = vadd.f32 %v178_v17, %v127_v18 }
 0x10a   :  { %131 = vst [vmem:[%s253_s5] sm:$0xff] %v128_v19 }
 0x10f   :  { %v129_v20 = vpop.f32.mrf.mxu1 }

</bundles_post_ra>
